<compile_context>
chip_gen: v7x
topology: tpu7x:2x2x1
jax: 0.10.0
libtpu: 0.0.40
codegen_flags: <defaults>
</compile_context>

<pallas_src>
import functools

import jax
import jax.numpy as jnp
from jax.experimental import pallas as pl
from jax.experimental.pallas import tpu as pltpu

LANE = 128


# ---------------------------------------------------------------------------
# Hardware-aware sizing helpers.
# ---------------------------------------------------------------------------
def _round_up(x, m):
    return ((x + m - 1) // m) * m


def _vmem_capacity_bytes():
    try:
        return int(pltpu.get_tpu_info().vmem_capacity_bytes)
    except Exception:
        return 64 * 1024 * 1024  # conservative fallback (v7x per-core VMEM)


def _vmem_limit_bytes():
    # ~half of physical VMEM: 64 MiB on v5e/v6e (128 MiB), 32 MiB on v7x (64 MiB).
    return min(_vmem_capacity_bytes() // 2, 64 * 1024 * 1024)


def _fused_budget_bytes():
    return int(0.75 * _vmem_limit_bytes())


def _tiled_defaults():
    """(tm, tn, tk) for the (M, N, K)-tiled kernel, per generation."""
    if _vmem_capacity_bytes() <= 80 * 1024 * 1024:   # v7x-class (64 MiB VMEM)
        return 256, 512, 512
    return 512, 512, 1024                            # v5e / v6e (128 MiB VMEM)


def _choose_tm(B):
    if B < 16:
        return B
    # Split M into >= 2 "parallel" programs (keeps both v7x TensorCores busy).
    return min(_round_up(pl.cdiv(B, 2), 8), 256)


# ---------------------------------------------------------------------------
# Fused group kernel: out = [ReLU](b_n + ... ReLU(x @ W1 + b1) ... @ Wn)
# Weights/biases are VMEM-resident across the M grid; intermediate
# activations never touch HBM inside a group.
# ---------------------------------------------------------------------------
def _fused_group_kernel(*refs, n_layers, final_relu, compute_dtype):
    x_ref, o_ref = refs[0], refs[-1]
    h = x_ref[...]
    for li in range(n_layers):
        w_ref = refs[1 + 2 * li]
        b_ref = refs[2 + 2 * li]
        # Feed the MXU in the weights' native (bf16) dtype; accumulate in f32.
        acc = jnp.dot(h.astype(w_ref.dtype), w_ref[...],
                      preferred_element_type=jnp.float32)
        acc = acc + b_ref[...].astype(jnp.float32)
        if li < n_layers - 1:
            h = jnp.maximum(acc, 0.0).astype(compute_dtype)
        else:
            if final_relu:
                acc = jnp.maximum(acc, 0.0)
            o_ref[...] = acc.astype(o_ref.dtype)


def _fused_group_call(h, group, *, final_relu, out_dtype, tm,
                      single_buffer_weights):
    B, d0 = h.shape
    d_out = group[-1][0].shape[1]
    grid = (pl.cdiv(B, tm),)

    wb_kwargs = {}
    if single_buffer_weights:
        # Grid-invariant blocks: no need for double buffering.
        wb_kwargs["pipeline_mode"] = pl.Buffered(1)

    in_specs = [pl.BlockSpec((tm, d0), lambda i: (i, 0))]
    args = [h]
    flops = 0
    bytes_acc = h.size * h.dtype.itemsize
    for w, b in group:
        din, dout = w.shape
        in_specs.append(pl.BlockSpec((din, dout), lambda i: (0, 0), **wb_kwargs))
        in_specs.append(pl.BlockSpec((1, dout), lambda i: (0, 0), **wb_kwargs))
        args += [w, b.reshape(1, dout)]
        flops += 2 * B * din * dout
        bytes_acc += w.size * w.dtype.itemsize + b.size * b.dtype.itemsize
    bytes_acc += B * d_out * jnp.dtype(out_dtype).itemsize

    kernel = functools.partial(_fused_group_kernel, n_layers=len(group),
                               final_relu=final_relu,
                               compute_dtype=group[0][0].dtype)
    return pl.pallas_call(
        kernel,
        out_shape=jax.ShapeDtypeStruct((B, d_out), out_dtype),
        grid=grid,
        in_specs=in_specs,
        out_specs=pl.BlockSpec((tm, d_out), lambda i: (i, 0)),
        compiler_params=pltpu.CompilerParams(
            dimension_semantics=("parallel",),
            vmem_limit_bytes=_vmem_limit_bytes()),
        cost_estimate=pl.CostEstimate(flops=flops, transcendentals=0,
                                      bytes_accessed=bytes_acc),
    )(*args)


def _fused_group(h, group, *, final_relu, out_dtype, tm):
    for single_buffer_weights in (True, False):
        try:
            return _fused_group_call(h, group, final_relu=final_relu,
                                     out_dtype=out_dtype, tm=tm,
                                     single_buffer_weights=single_buffer_weights)
        except Exception:  # Buffered(1) unsupported / VMEM too tight: fall back
            continue
    # Last resort: run the group one (M, N, K)-tiled layer at a time.
    n = len(group)
    for li, (w, b) in enumerate(group):
        last = li == n - 1
        h = linear_tiled(h, w, b,
                         apply_relu=final_relu or not last,
                         out_dtype=out_dtype if last else w.dtype)
    return h


# ---------------------------------------------------------------------------
# General (M, N, K)-tiled linear (+bias, +optional ReLU) kernel.
# ---------------------------------------------------------------------------
def _tiled_linear_kernel(x_ref, w_ref, b_ref, o_ref, acc_ref, *, apply_relu):
    k = pl.program_id(2)

    @pl.when(k == 0)
    def _():
        acc_ref[...] = jnp.zeros_like(acc_ref)

    acc_ref[...] += jnp.dot(x_ref[...].astype(w_ref.dtype), w_ref[...],
                            preferred_element_type=jnp.float32)

    @pl.when(k == pl.num_programs(2) - 1)
    def _():
        y = acc_ref[...] + b_ref[...].astype(jnp.float32)
        if apply_relu:
            y = jnp.maximum(y, 0.0)
        o_ref[...] = y.astype(o_ref.dtype)


def _pick_reduction_tile(K, pref):
    """K tile must divide K exactly (no masked reduction). Returns (tk, K_pad)."""
    for cand in (pref, 1024, 512, 256, 128):
        if 128 <= cand <= K and cand % 128 == 0 and K % cand == 0:
            return cand, K
    if K <= 256:
        return K, K                      # small K: one full-extent block
    Kp = _round_up(K, 128)               # otherwise zero-pad K in the wrapper
    for cand in (pref, 1024, 512, 256, 128):
        if 128 <= cand <= Kp and cand % 128 == 0 and Kp % cand == 0:
            return cand, Kp
    return 128, Kp


def linear_tiled(x, w, b, *, apply_relu, out_dtype=None,
                 tm=None, tn=None, tk=None):
    """y = act(x @ w + b) with an (M, N, K)-tiled, pipelined Pallas kernel."""
    M, K = x.shape
    Kw, N = w.shape
    assert K == Kw, (K, Kw)
    out_dtype = out_dtype or x.dtype

    dtm, dtn, dtk = _tiled_defaults()
    tm = tm or dtm
    tn = tn or dtn
    tk = tk or dtk

    tk, Kp = _pick_reduction_tile(K, tk)
    if Kp != K:
        # Zero padding contributes nothing to the contraction.
        x = jnp.pad(x, ((0, 0), (0, Kp - K)))
        w = jnp.pad(w, ((0, Kp - K), (0, 0)))
        K = Kp

    tm = M if M < tm else tm             # edge M/N blocks are masked on store
    tn = N if N < tn else tn
    grid = (pl.cdiv(M, tm), pl.cdiv(N, tn), K // tk)

    cost = pl.CostEstimate(
        flops=2 * M * K * N, transcendentals=0,
        bytes_accessed=(x.size * x.dtype.itemsize + w.size * w.dtype.itemsize +
                        b.size * b.dtype.itemsize +
                        M * N * jnp.dtype(out_dtype).itemsize))

    kernel = functools.partial(_tiled_linear_kernel, apply_relu=apply_relu)
    return pl.pallas_call(
        kernel,
        out_shape=jax.ShapeDtypeStruct((M, N), out_dtype),
        grid=grid,
        in_specs=[
            pl.BlockSpec((tm, tk), lambda i, j, k: (i, k)),
            pl.BlockSpec((tk, tn), lambda i, j, k: (k, j)),
            pl.BlockSpec((1, tn), lambda i, j, k: (0, j)),
        ],
        out_specs=pl.BlockSpec((tm, tn), lambda i, j, k: (i, j)),
        scratch_shapes=[pltpu.VMEM((tm, tn), jnp.float32)],
        compiler_params=pltpu.CompilerParams(
            dimension_semantics=("parallel", "parallel", "arbitrary"),
            vmem_limit_bytes=_vmem_limit_bytes()),
        cost_estimate=cost,
    )(x, w, b.reshape(1, N))


# ---------------------------------------------------------------------------
# Parameters, prep (scale folding + lane padding + bf16 cast), forward.
# ---------------------------------------------------------------------------
def init_mlp_scaled_params(layers_dim, key, dtype=jnp.float32):
    """Parameter init mirroring the module's __init__ shapes."""
    params = []
    for din, dout in zip(layers_dim[:-1], layers_dim[1:]):
        key, kw, kb = jax.random.split(key, 3)
        bound = 1.0 / float(din) ** 0.5
        # PyTorch Linear weight is (dout, din); stored transposed (din, dout).
        w = jax.random.uniform(kw, (din, dout), jnp.float32, -bound, bound)
        b = jax.random.uniform(kb, (dout,), jnp.float32, -bound, bound)
        # TODO(synk): aux_modules.PreAct unavailable; modeled as 1/sqrt(din) scale.
        scale = jnp.full((din,), 1.0 / float(din) ** 0.5, jnp.float32)
        params.append({"scale": scale.astype(dtype), "w": w.astype(dtype),
                       "b": b.astype(dtype)})
    return params


def prepare_mlp_scaled_params(params, compute_dtype=jnp.bfloat16):
    """One-time prep: fold PreAct scale into W ((x*s)@W == x@(diag(s)W)),
    zero-pad feature dims to multiples of 128 (lane-dense stores), cast
    weights to bf16 (MXU-native) and keep biases in f32."""
    layers = []
    for li, p in enumerate(params):
        w = p["scale"].astype(jnp.float32)[:, None] * p["w"].astype(jnp.float32)
        din, dout = w.shape
        din_pad = din if li == 0 else _round_up(din, LANE)
        dout_pad = _round_up(dout, LANE)
        w = jnp.pad(w, ((0, din_pad - din), (0, dout_pad - dout)))
        b = jnp.pad(p["b"].astype(jnp.float32), (0, dout_pad - dout))
        layers.append((w.astype(compute_dtype), b))
    return {"layers": layers, "out_dim": params[-1]["w"].shape[1]}


def _group_footprint_bytes(tm, group, out_itemsize=4):
    """Fused-group VMEM footprint (weights single-buffered, x/out pipelined)."""
    din0 = group[0][0].shape[0]
    total = 2 * tm * din0 * 4
    for w, b in group:
        total += w.size * w.dtype.itemsize + b.size * 4
        total += tm * w.shape[1] * 4         # intermediate-activation headroom
    total += 2 * tm * group[-1][0].shape[1] * out_itemsize
    return total


def _plan_groups(layers, tm, budget):
    """Greedily group consecutive layers whose weights stay VMEM-resident."""
    groups, cur = [], []
    for layer in layers:
        trial = cur + [layer]
        if cur and _group_footprint_bytes(tm, trial) > budget:
            groups.append(cur)
            cur = [layer]
        else:
            cur = trial
    groups.append(cur)
    return groups


def mlp_scaled_forward(x, prepared, out_dtype=None):
    """Forward pass: flatten, hidden layers (+ReLU), final layer (no act)."""
    layers = prepared["layers"]
    out_dim = prepared["out_dim"]
    B = x.shape[0]
    h = x.reshape(B, -1)                     # x.flatten(start_dim=1)
    out_dtype = jnp.dtype(out_dtype or x.dtype)

    tm = _choose_tm(B)
    budget = _fused_budget_bytes()
    compute_dtype = layers[0][0].dtype       # bf16 activations between groups
    groups = _plan_groups(layers, tm, budget)

    for gi, group in enumerate(groups):
        last_group = gi == len(groups) - 1
        g_dtype = out_dtype if last_group else compute_dtype
        if _group_footprint_bytes(tm, group) <= budget:
            h = _fused_group(h, group, final_relu=not last_group,
                             out_dtype=g_dtype, tm=tm)
        else:
            # Oversized layer(s): (M, N, K)-tiled kernel per layer.
            n = len(group)
            for li, (w, b) in enumerate(group):
                last = last_group and li == n - 1
                h = linear_tiled(h, w, b, apply_relu=not last,
                                 out_dtype=g_dtype if li == n - 1 else compute_dtype)

    if h.shape[1] != out_dim:                # strip lane padding
        h = h[:, :out_dim]
    return h


def mlp_scaled_reference(x, params):
    """Pure-jnp reference (f32) for correctness checking."""
    B = x.shape[0]
    h = x.reshape(B, -1).astype(jnp.float32)
    n = len(params)
    for li, p in enumerate(params):
        h = (h * p["scale"].astype(jnp.float32)) @ p["w"].astype(jnp.float32)
        h = h + p["b"].astype(jnp.float32)
        if li < n - 1:
            h = jnp.maximum(h, 0.0)
    return h


if __name__ == "__main__":
    key = jax.random.PRNGKey(0)
    kx, kp, kx2, kw2 = jax.random.split(key, 4)

    # Small NCHW input: batch=2, channels=4, spatial=4x4 -> flattened dim 64.
    x = jax.random.normal(kx, (2, 4, 4, 4), jnp.float32)
    layers_dim = [64, 32, 32, 16]
    params = init_mlp_scaled_params(layers_dim, kp)
    prepared = prepare_mlp_scaled_params(params)

    out = jax.block_until_ready(mlp_scaled_forward(x, prepared))
    assert out.shape == (2, layers_dim[-1]), out.shape
    ref = mlp_scaled_reference(x, params)
    err = jnp.max(jnp.abs(out.astype(jnp.float32) - ref))
    scale = jnp.max(jnp.abs(ref)) + 1e-6
    assert float(err / scale) < 3e-2, ("fused MLP mismatch", float(err), float(scale))

    # Also exercise the (M, N, K)-tiled path with a multi-step K reduction.
    xb = jax.random.normal(kx2, (256, 384), jnp.float32)
    wb = (jax.random.normal(kw2, (384, 256), jnp.float32) * 0.05).astype(jnp.bfloat16)
    bb = jnp.full((256,), 0.1, jnp.float32)
    yb = jax.block_until_ready(linear_tiled(xb, wb, bb, apply_relu=True))
    yref = jnp.maximum(xb @ wb.astype(jnp.float32) + bb, 0.0)
    errb = float(jnp.max(jnp.abs(yb - yref)) / (jnp.max(jnp.abs(yref)) + 1e-6))
    assert errb < 2e-2, ("tiled linear mismatch", errb)

    print("KERNEL_OK")
</pallas_src>

<mosaic_0001>
module attributes {stable_mosaic.version = 11 : i64} {
  func.func @_fused_group_kernel(%arg0: i32, %arg1: memref<2x64xf32, #tpu.memory_space<vmem>>, %arg2: memref<64x128xbf16, #tpu.memory_space<vmem>>, %arg3: memref<1x128xf32, #tpu.memory_space<vmem>>, %arg4: memref<128x128xbf16, #tpu.memory_space<vmem>>, %arg5: memref<1x128xf32, #tpu.memory_space<vmem>>, %arg6: memref<128x128xbf16, #tpu.memory_space<vmem>>, %arg7: memref<1x128xf32, #tpu.memory_space<vmem>>, %arg8: memref<2x128xf32, #tpu.memory_space<vmem>>) attributes {dimension_semantics = [#tpu.dimension_semantics<parallel>], iteration_bounds = array<i64: 1>, scalar_prefetch = 0 : i64, scratch_operands = 0 : i64, tpu.core_type = #tpu.core_type<tc>, window_params = [{transform_indices = @transform_0, window_bounds = array<i64: 2, 64>}, {pipeline_mode = #tpu.pipeline_mode<synchronous>, transform_indices = @transform_1, window_bounds = array<i64: 64, 128>}, {pipeline_mode = #tpu.pipeline_mode<synchronous>, transform_indices = @transform_2, window_bounds = array<i64: 1, 128>}, {pipeline_mode = #tpu.pipeline_mode<synchronous>, transform_indices = @transform_3, window_bounds = array<i64: 128, 128>}, {pipeline_mode = #tpu.pipeline_mode<synchronous>, transform_indices = @transform_4, window_bounds = array<i64: 1, 128>}, {pipeline_mode = #tpu.pipeline_mode<synchronous>, transform_indices = @transform_5, window_bounds = array<i64: 128, 128>}, {pipeline_mode = #tpu.pipeline_mode<synchronous>, transform_indices = @transform_6, window_bounds = array<i64: 1, 128>}, {transform_indices = @transform_7, window_bounds = array<i64: 2, 128>}]} {
    %c0 = arith.constant 0 : index
    %c0_0 = arith.constant 0 : index
    %0 = vector.load %arg1[%c0, %c0_0] : memref<2x64xf32, #tpu.memory_space<vmem>>, vector<2x64xf32>
    %1 = arith.truncf %0 : vector<2x64xf32> to vector<2x64xbf16>
    %c0_1 = arith.constant 0 : index
    %c0_2 = arith.constant 0 : index
    %2 = vector.load %arg2[%c0_1, %c0_2] : memref<64x128xbf16, #tpu.memory_space<vmem>>, vector<64x128xbf16>
    %cst = arith.constant dense<0.000000e+00> : vector<2x128xf32>
    %3 = tpu.matmul %1, %2, %cst {dimension_numbers = #tpu.dot_dimension_numbers<[1], [0], [0], [1], [0, 0, 1, 1], [], []>} : vector<2x64xbf16>, vector<64x128xbf16>, vector<2x128xf32> -> vector<2x128xf32>
    %c0_3 = arith.constant 0 : index
    %c0_4 = arith.constant 0 : index
    %4 = vector.load %arg3[%c0_3, %c0_4] : memref<1x128xf32, #tpu.memory_space<vmem>>, vector<1x128xf32>
    %5 = vector.broadcast %4 : vector<1x128xf32> to vector<2x128xf32>
    %6 = arith.addf %3, %5 : vector<2x128xf32>
    %cst_5 = arith.constant 0.000000e+00 : f32
    %7 = vector.broadcast %cst_5 : f32 to vector<2x128xf32>
    %8 = arith.maximumf %6, %7 : vector<2x128xf32>
    %9 = arith.truncf %8 : vector<2x128xf32> to vector<2x128xbf16>
    %c0_6 = arith.constant 0 : index
    %c0_7 = arith.constant 0 : index
    %10 = vector.load %arg4[%c0_6, %c0_7] : memref<128x128xbf16, #tpu.memory_space<vmem>>, vector<128x128xbf16>
    %cst_8 = arith.constant dense<0.000000e+00> : vector<2x128xf32>
    %11 = tpu.matmul %9, %10, %cst_8 {dimension_numbers = #tpu.dot_dimension_numbers<[1], [0], [0], [1], [0, 0, 1, 1], [], []>} : vector<2x128xbf16>, vector<128x128xbf16>, vector<2x128xf32> -> vector<2x128xf32>
    %c0_9 = arith.constant 0 : index
    %c0_10 = arith.constant 0 : index
    %12 = vector.load %arg5[%c0_9, %c0_10] : memref<1x128xf32, #tpu.memory_space<vmem>>, vector<1x128xf32>
    %13 = vector.broadcast %12 : vector<1x128xf32> to vector<2x128xf32>
    %14 = arith.addf %11, %13 : vector<2x128xf32>
    %cst_11 = arith.constant 0.000000e+00 : f32
    %15 = vector.broadcast %cst_11 : f32 to vector<2x128xf32>
    %16 = arith.maximumf %14, %15 : vector<2x128xf32>
    %17 = arith.truncf %16 : vector<2x128xf32> to vector<2x128xbf16>
    %c0_12 = arith.constant 0 : index
    %c0_13 = arith.constant 0 : index
    %18 = vector.load %arg6[%c0_12, %c0_13] : memref<128x128xbf16, #tpu.memory_space<vmem>>, vector<128x128xbf16>
    %cst_14 = arith.constant dense<0.000000e+00> : vector<2x128xf32>
    %19 = tpu.matmul %17, %18, %cst_14 {dimension_numbers = #tpu.dot_dimension_numbers<[1], [0], [0], [1], [0, 0, 1, 1], [], []>} : vector<2x128xbf16>, vector<128x128xbf16>, vector<2x128xf32> -> vector<2x128xf32>
    %c0_15 = arith.constant 0 : index
    %c0_16 = arith.constant 0 : index
    %20 = vector.load %arg7[%c0_15, %c0_16] : memref<1x128xf32, #tpu.memory_space<vmem>>, vector<1x128xf32>
    %21 = vector.broadcast %20 : vector<1x128xf32> to vector<2x128xf32>
    %22 = arith.addf %19, %21 : vector<2x128xf32>
    %c0_17 = arith.constant 0 : index
    %c0_18 = arith.constant 0 : index
    %23 = vector.load %arg8[%c0_17, %c0_18] : memref<2x128xf32, #tpu.memory_space<vmem>>, vector<2x128xf32>
    tpu.vector_store %arg8[%c0_17, %c0_18], %22 {strides = array<i32>} : memref<2x128xf32, #tpu.memory_space<vmem>>, vector<2x128xf32>,
    return
  }
  func.func @transform_0(%arg0: i32) -> (i32, i32) {
    %c0_i32 = arith.constant 0 : i32
    %c0_i32_0 = arith.constant 0 : i32
    return %arg0, %c0_i32 : i32, i32
  }
  func.func @transform_1(%arg0: i32) -> (i32, i32) {
    %c0_i32 = arith.constant 0 : i32
    %c0_i32_0 = arith.constant 0 : i32
    %c0_i32_1 = arith.constant 0 : i32
    return %c0_i32, %c0_i32_0 : i32, i32
  }
  func.func @transform_2(%arg0: i32) -> (i32, i32) {
    %c0_i32 = arith.constant 0 : i32
    %c0_i32_0 = arith.constant 0 : i32
    %c0_i32_1 = arith.constant 0 : i32
    return %c0_i32, %c0_i32_0 : i32, i32
  }
  func.func @transform_3(%arg0: i32) -> (i32, i32) {
    %c0_i32 = arith.constant 0 : i32
    %c0_i32_0 = arith.constant 0 : i32
    %c0_i32_1 = arith.constant 0 : i32
    return %c0_i32, %c0_i32_0 : i32, i32
  }
  func.func @transform_4(%arg0: i32) -> (i32, i32) {
    %c0_i32 = arith.constant 0 : i32
    %c0_i32_0 = arith.constant 0 : i32
    %c0_i32_1 = arith.constant 0 : i32
    return %c0_i32, %c0_i32_0 : i32, i32
  }
  func.func @transform_5(%arg0: i32) -> (i32, i32) {
    %c0_i32 = arith.constant 0 : i32
    %c0_i32_0 = arith.constant 0 : i32
    %c0_i32_1 = arith.constant 0 : i32
    return %c0_i32, %c0_i32_0 : i32, i32
  }
  func.func @transform_6(%arg0: i32) -> (i32, i32) {
    %c0_i32 = arith.constant 0 : i32
    %c0_i32_0 = arith.constant 0 : i32
    %c0_i32_1 = arith.constant 0 : i32
    return %c0_i32, %c0_i32_0 : i32, i32
  }
  func.func @transform_7(%arg0: i32) -> (i32, i32) {
    %c0_i32 = arith.constant 0 : i32
    %c0_i32_0 = arith.constant 0 : i32
    return %arg0, %c0_i32 : i32, i32
  }
}

module attributes {stable_mosaic.version = 11 : i64} {
  func.func @_fused_group_kernel(%arg0: i32, %arg1: memref<2x64xf32, #tpu.memory_space<vmem>>, %arg2: memref<64x128xbf16, #tpu.memory_space<vmem>>, %arg3: memref<1x128xf32, #tpu.memory_space<vmem>>, %arg4: memref<128x128xbf16, #tpu.memory_space<vmem>>, %arg5: memref<1x128xf32, #tpu.memory_space<vmem>>, %arg6: memref<128x128xbf16, #tpu.memory_space<vmem>>, %arg7: memref<1x128xf32, #tpu.memory_space<vmem>>, %arg8: memref<2x128xf32, #tpu.memory_space<vmem>>) attributes {dimension_semantics = [#tpu.dimension_semantics<parallel>], iteration_bounds = array<i64: 1>, scalar_prefetch = 0 : i64, scratch_operands = 0 : i64, tpu.core_type = #tpu.core_type<tc>, window_params = [{transform_indices = @transform_0, window_bounds = array<i64: 2, 64>}, {pipeline_mode = #tpu.pipeline_mode<synchronous>, transform_indices = @transform_1, window_bounds = array<i64: 64, 128>}, {pipeline_mode = #tpu.pipeline_mode<synchronous>, transform_indices = @transform_2, window_bounds = array<i64: 1, 128>}, {pipeline_mode = #tpu.pipeline_mode<synchronous>, transform_indices = @transform_3, window_bounds = array<i64: 128, 128>}, {pipeline_mode = #tpu.pipeline_mode<synchronous>, transform_indices = @transform_4, window_bounds = array<i64: 1, 128>}, {pipeline_mode = #tpu.pipeline_mode<synchronous>, transform_indices = @transform_5, window_bounds = array<i64: 128, 128>}, {pipeline_mode = #tpu.pipeline_mode<synchronous>, transform_indices = @transform_6, window_bounds = array<i64: 1, 128>}, {transform_indices = @transform_7, window_bounds = array<i64: 2, 128>}]} {
    %c0 = arith.constant 0 : index
    %c0_0 = arith.constant 0 : index
    %0 = vector.load %arg1[%c0, %c0_0] : memref<2x64xf32, #tpu.memory_space<vmem>>, vector<2x64xf32>
    %1 = arith.truncf %0 : vector<2x64xf32> to vector<2x64xbf16>
    %c0_1 = arith.constant 0 : index
    %c0_2 = arith.constant 0 : index
    %2 = vector.load %arg2[%c0_1, %c0_2] : memref<64x128xbf16, #tpu.memory_space<vmem>>, vector<64x128xbf16>
    %cst = arith.constant dense<0.000000e+00> : vector<2x128xf32>
    %3 = tpu.matmul %1, %2, %cst {dimension_numbers = #tpu.dot_dimension_numbers<[1], [0], [0], [1], [0, 0, 1, 1], [], []>} : vector<2x64xbf16>, vector<64x128xbf16>, vector<2x128xf32> -> vector<2x128xf32>
    %c0_3 = arith.constant 0 : index
    %c0_4 = arith.constant 0 : index
    %4 = vector.load %arg3[%c0_3, %c0_4] : memref<1x128xf32, #tpu.memory_space<vmem>>, vector<1x128xf32>
    %5 = vector.broadcast %4 : vector<1x128xf32> to vector<2x128xf32>
    %6 = arith.addf %3, %5 : vector<2x128xf32>
    %cst_5 = arith.constant 0.000000e+00 : f32
    %7 = vector.broadcast %cst_5 : f32 to vector<2x128xf32>
    %8 = arith.maximumf %6, %7 : vector<2x128xf32>
    %9 = arith.truncf %8 : vector<2x128xf32> to vector<2x128xbf16>
    %c0_6 = arith.constant 0 : index
    %c0_7 = arith.constant 0 : index
    %10 = vector.load %arg4[%c0_6, %c0_7] : memref<128x128xbf16, #tpu.memory_space<vmem>>, vector<128x128xbf16>
    %cst_8 = arith.constant dense<0.000000e+00> : vector<2x128xf32>
    %11 = tpu.matmul %9, %10, %cst_8 {dimension_numbers = #tpu.dot_dimension_numbers<[1], [0], [0], [1], [0, 0, 1, 1], [], []>} : vector<2x128xbf16>, vector<128x128xbf16>, vector<2x128xf32> -> vector<2x128xf32>
    %c0_9 = arith.constant 0 : index
    %c0_10 = arith.constant 0 : index
    %12 = vector.load %arg5[%c0_9, %c0_10] : memref<1x128xf32, #tpu.memory_space<vmem>>, vector<1x128xf32>
    %13 = vector.broadcast %12 : vector<1x128xf32> to vector<2x128xf32>
    %14 = arith.addf %11, %13 : vector<2x128xf32>
    %cst_11 = arith.constant 0.000000e+00 : f32
    %15 = vector.broadcast %cst_11 : f32 to vector<2x128xf32>
    %16 = arith.maximumf %14, %15 : vector<2x128xf32>
    %17 = arith.truncf %16 : vector<2x128xf32> to vector<2x128xbf16>
    %c0_12 = arith.constant 0 : index
    %c0_13 = arith.constant 0 : index
    %18 = vector.load %arg6[%c0_12, %c0_13] : memref<128x128xbf16, #tpu.memory_space<vmem>>, vector<128x128xbf16>
    %cst_14 = arith.constant dense<0.000000e+00> : vector<2x128xf32>
    %19 = tpu.matmul %17, %18, %cst_14 {dimension_numbers = #tpu.dot_dimension_numbers<[1], [0], [0], [1], [0, 0, 1, 1], [], []>} : vector<2x128xbf16>, vector<128x128xbf16>, vector<2x128xf32> -> vector<2x128xf32>
    %c0_15 = arith.constant 0 : index
    %c0_16 = arith.constant 0 : index
    %20 = vector.load %arg7[%c0_15, %c0_16] : memref<1x128xf32, #tpu.memory_space<vmem>>, vector<1x128xf32>
    %21 = vector.broadcast %20 : vector<1x128xf32> to vector<2x128xf32>
    %22 = arith.addf %19, %21 : vector<2x128xf32>
    %c0_17 = arith.constant 0 : index
    %c0_18 = arith.constant 0 : index
    %23 = vector.load %arg8[%c0_17, %c0_18] : memref<2x128xf32, #tpu.memory_space<vmem>>, vector<2x128xf32>
    tpu.vector_store %arg8[%c0_17, %c0_18], %22 {strides = array<i32>} : memref<2x128xf32, #tpu.memory_space<vmem>>, vector<2x128xf32>,
    return
  }
  func.func @transform_0(%arg0: i32) -> (i32, i32) {
    %c0_i32 = arith.constant 0 : i32
    %c0_i32_0 = arith.constant 0 : i32
    return %arg0, %c0_i32 : i32, i32
  }
  func.func @transform_1(%arg0: i32) -> (i32, i32) {
    %c0_i32 = arith.constant 0 : i32
    %c0_i32_0 = arith.constant 0 : i32
    %c0_i32_1 = arith.constant 0 : i32
    return %c0_i32, %c0_i32_0 : i32, i32
  }
  func.func @transform_2(%arg0: i32) -> (i32, i32) {
    %c0_i32 = arith.constant 0 : i32
    %c0_i32_0 = arith.constant 0 : i32
    %c0_i32_1 = arith.constant 0 : i32
    return %c0_i32, %c0_i32_0 : i32, i32
  }
  func.func @transform_3(%arg0: i32) -> (i32, i32) {
    %c0_i32 = arith.constant 0 : i32
    %c0_i32_0 = arith.constant 0 : i32
    %c0_i32_1 = arith.constant 0 : i32
    return %c0_i32, %c0_i32_0 : i32, i32
  }
  func.func @transform_4(%arg0: i32) -> (i32, i32) {
    %c0_i32 = arith.constant 0 : i32
    %c0_i32_0 = arith.constant 0 : i32
    %c0_i32_1 = arith.constant 0 : i32
    return %c0_i32, %c0_i32_0 : i32, i32
  }
  func.func @transform_5(%arg0: i32) -> (i32, i32) {
    %c0_i32 = arith.constant 0 : i32
    %c0_i32_0 = arith.constant 0 : i32
    %c0_i32_1 = arith.constant 0 : i32
    return %c0_i32, %c0_i32_0 : i32, i32
  }
  func.func @transform_6(%arg0: i32) -> (i32, i32) {
    %c0_i32 = arith.constant 0 : i32
    %c0_i32_0 = arith.constant 0 : i32
    %c0_i32_1 = arith.constant 0 : i32
    return %c0_i32, %c0_i32_0 : i32, i32
  }
  func.func @transform_7(%arg0: i32) -> (i32, i32) {
    %c0_i32 = arith.constant 0 : i32
    %c0_i32_0 = arith.constant 0 : i32
    return %arg0, %c0_i32 : i32, i32
  }
}

module attributes {stable_mosaic.version = 11 : i64} {
  func.func @_tiled_linear_kernel(%arg0: i32, %arg1: i32, %arg2: i32, %arg3: memref<2x64xf32, #tpu.memory_space<vmem>>, %arg4: memref<64x128xbf16, #tpu.memory_space<vmem>>, %arg5: memref<1x128xf32, #tpu.memory_space<vmem>>, %arg6: memref<2x128xbf16, #tpu.memory_space<vmem>>, %arg7: memref<2x128xf32, #tpu.memory_space<vmem>>) attributes {dimension_semantics = [#tpu.dimension_semantics<parallel>, #tpu.dimension_semantics<parallel>, #tpu.dimension_semantics<arbitrary>], iteration_bounds = array<i64: 1, 1, 1>, scalar_prefetch = 0 : i64, scratch_operands = 1 : i64, tpu.core_type = #tpu.core_type<tc>, window_params = [{transform_indices = @transform_0, window_bounds = array<i64: 2, 64>}, {transform_indices = @transform_1, window_bounds = array<i64: 64, 128>}, {transform_indices = @transform_2, window_bounds = array<i64: 1, 128>}, {transform_indices = @transform_3, window_bounds = array<i64: 2, 128>}]} {
    %c0_i32 = arith.constant 0 : i32
    %0 = arith.cmpi eq, %arg2, %c0_i32 : i32
    %1 = arith.extui %0 : i1 to i32
    %c0_i32_0 = arith.constant 0 : i32
    %2 = arith.cmpi ne, %1, %c0_i32_0 : i32
    scf.if %2 {
      %cst_10 = arith.constant 0.000000e+00 : f32
      %13 = vector.broadcast %cst_10 : f32 to vector<2x128xf32>
      %c0_11 = arith.constant 0 : index
      %c0_12 = arith.constant 0 : index
      %14 = vector.load %arg7[%c0_11, %c0_12] : memref<2x128xf32, #tpu.memory_space<vmem>>, vector<2x128xf32>
      tpu.vector_store %arg7[%c0_11, %c0_12], %13 {strides = array<i32>} : memref<2x128xf32, #tpu.memory_space<vmem>>, vector<2x128xf32>,
    } else {
    }
    %c0 = arith.constant 0 : index
    %c0_1 = arith.constant 0 : index
    %3 = vector.load %arg7[%c0, %c0_1] : memref<2x128xf32, #tpu.memory_space<vmem>>, vector<2x128xf32>
    %c0_2 = arith.constant 0 : index
    %c0_3 = arith.constant 0 : index
    %4 = vector.load %arg3[%c0_2, %c0_3] : memref<2x64xf32, #tpu.memory_space<vmem>>, vector<2x64xf32>
    %5 = arith.truncf %4 : vector<2x64xf32> to vector<2x64xbf16>
    %c0_4 = arith.constant 0 : index
    %c0_5 = arith.constant 0 : index
    %6 = vector.load %arg4[%c0_4, %c0_5] : memref<64x128xbf16, #tpu.memory_space<vmem>>, vector<64x128xbf16>
    %cst = arith.constant dense<0.000000e+00> : vector<2x128xf32>
    %7 = tpu.matmul %5, %6, %cst {dimension_numbers = #tpu.dot_dimension_numbers<[1], [0], [0], [1], [0, 0, 1, 1], [], []>} : vector<2x64xbf16>, vector<64x128xbf16>, vector<2x128xf32> -> vector<2x128xf32>
    %8 = arith.addf %3, %7 : vector<2x128xf32>
    %c0_6 = arith.constant 0 : index
    %c0_7 = arith.constant 0 : index
    %9 = vector.load %arg7[%c0_6, %c0_7] : memref<2x128xf32, #tpu.memory_space<vmem>>, vector<2x128xf32>
    tpu.vector_store %arg7[%c0_6, %c0_7], %8 {strides = array<i32>} : memref<2x128xf32, #tpu.memory_space<vmem>>, vector<2x128xf32>,
    %c0_i32_8 = arith.constant 0 : i32
    %10 = arith.cmpi eq, %arg2, %c0_i32_8 : i32
    %11 = arith.extui %10 : i1 to i32
    %c0_i32_9 = arith.constant 0 : i32
    %12 = arith.cmpi ne, %11, %c0_i32_9 : i32
    scf.if %12 {
      %c0_10 = arith.constant 0 : index
      %c0_11 = arith.constant 0 : index
      %13 = vector.load %arg7[%c0_10, %c0_11] : memref<2x128xf32, #tpu.memory_space<vmem>>, vector<2x128xf32>
      %c0_12 = arith.constant 0 : index
      %c0_13 = arith.constant 0 : index
      %14 = vector.load %arg5[%c0_12, %c0_13] : memref<1x128xf32, #tpu.memory_space<vmem>>, vector<1x128xf32>
      %15 = vector.broadcast %14 : vector<1x128xf32> to vector<2x128xf32>
      %16 = arith.addf %13, %15 : vector<2x128xf32>
      %cst_14 = arith.constant 0.000000e+00 : f32
      %17 = vector.broadcast %cst_14 : f32 to vector<2x128xf32>
      %18 = arith.maximumf %16, %17 : vector<2x128xf32>
      %19 = arith.truncf %18 : vector<2x128xf32> to vector<2x128xbf16>
      %c0_15 = arith.constant 0 : index
      %c0_16 = arith.constant 0 : index
      %20 = vector.load %arg6[%c0_15, %c0_16] : memref<2x128xbf16, #tpu.memory_space<vmem>>, vector<2x128xbf16>
      tpu.vector_store %arg6[%c0_15, %c0_16], %19 {strides = array<i32>} : memref<2x128xbf16, #tpu.memory_space<vmem>>, vector<2x128xbf16>,
    } else {
    }
    return
  }
  func.func @transform_0(%arg0: i32, %arg1: i32, %arg2: i32) -> (i32, i32) {
    %c0_i32 = arith.constant 0 : i32
    return %arg0, %arg2 : i32, i32
  }
  func.func @transform_1(%arg0: i32, %arg1: i32, %arg2: i32) -> (i32, i32) {
    %c0_i32 = arith.constant 0 : i32
    return %arg2, %arg1 : i32, i32
  }
  func.func @transform_2(%arg0: i32, %arg1: i32, %arg2: i32) -> (i32, i32) {
    %c0_i32 = arith.constant 0 : i32
    %c0_i32_0 = arith.constant 0 : i32
    return %c0_i32, %arg1 : i32, i32
  }
  func.func @transform_3(%arg0: i32, %arg1: i32, %arg2: i32) -> (i32, i32) {
    %c0_i32 = arith.constant 0 : i32
    return %arg0, %arg1 : i32, i32
  }
}

</mosaic_0001>

<bundles_post_ra>
// kernel: tpu_custom_call.1
= control target key start
LH: loop header
LB: loop body
LE: loop exit
PB: predicated region body
PF: predicated region fallthrough
CT: control target
= control target key end

     0   :  { %12 = vsyncpa [#allocation3], 0  ;;  %s809_s0 = inlined_call_operand.hbm [shape: f32[2,64], index: 0, kind: input, shape index: {}]   ;;  %s810_s1 = inlined_call_operand.hbm [shape: bf16[64,128], index: 1, kind: input, shape index: {}]   ;;  %s811_s2 = inlined_call_operand.vmem [shape: f32[1,128], index: 2, kind: input, shape index: {}]   ;;  %s812_s3 = inlined_call_operand.hbm [shape: bf16[128,128], index: 3, kind: input, shape index: {}]   ;;  %s813_s4 = inlined_call_operand.vmem [shape: f32[1,128], index: 4, kind: input, shape index: {}]   ;;  %s814_s5 = inlined_call_operand.hbm [shape: bf16[128,128], index: 5, kind: input, shape index: {}]   ;;  %s815_s6 = inlined_call_operand.vmem [shape: f32[1,128], index: 6, kind: input, shape index: {}]   ;;  %s816_s7 = inlined_call_operand.hbm [shape: f32[2,128], index: 7, kind: output, shape index: {}]  }
   0x1   :  { %13 = vsyncpa [#allocation6], 0 }
   0x2   :  { %14 = vsyncpa [#allocation9], 0 }
   0x3   :  { %15 = vsyncpa [#allocation4], 0  ;;  %s656_s24 = smov [#allocation5]   ;;  %s538_s28 = scalar_lea.hbm %s810_s1, 512 }
   0x4   :  { %s31_s25 = sshll.u32 %s656_s24, 4  ;;  %p539_p0 = scmp.ne.s32.totalorder %s810_s1, %s538_s28  ;;  %s32_s25 = int_to_ptr.vmem [resolvable:$true] %s31_s25 }
   0x5   :  { %p542_p1 = scmp.lt.u32.totalorder %s538_s28, %s810_s1 }
   0x7   :  { %p544_p2 = pnand %p542_p1, %p539_p0 }
   0x9   :  { %547 = shalt.err (!%p544_p2)
}
   0xa   :  { %s548_s10 = scalar_lea.vmem %s32_s25, 512  ;;  %p553_p4 = scmp.lt.s32.totalorder %s32_s25, %s32_s25 }
   0xb   :  { %p549_p3 = scmp.ne.s32.totalorder %s32_s25, %s548_s10  ;;  %p554_p5 = scmp.lt.s32.totalorder %s548_s10, %s548_s10 }
   0xd   :  { %p555_p6 = por %p554_p5, %p553_p4 }
   0xf   :  { %p556_p7 = pnand %p555_p6, %p549_p3 }
  0x11   :  { %559 = shalt.err (!%p556_p7)
}
  0x12   :  { %s657_s11 = smov 64   ;;  %s658_s12 = smov 4  }
  0x13   :  { %37 = dma.hbm_to_vmem [thread:$0]  %s810_s1, 512, %s32_s25, [#allocation6], %s657_s11, %s657_s11, %s658_s12  }
  0x14   :  { %s659_s15 = smov [#allocation2]   ;;  %s660_s17 = smov [#allocation7]  }
  0x15   :  { %s22_s16 = sshll.u32 %s659_s15, 4  ;;  %s45_s18 = sshll.u32 %s660_s17, 4  ;;  %s23_s16 = int_to_ptr.vmem [resolvable:$true] %s22_s16  ;;  %s46_s18 = int_to_ptr.vmem [resolvable:$true] %s45_s18 }
  0x16   :  { %s560_s21 = scalar_lea.hbm %s809_s0, 32 }
  0x17   :  { %p561_p8 = scmp.ne.s32.totalorder %s809_s0, %s560_s21  ;;  %p564_p9 = scmp.lt.u32.totalorder %s560_s21, %s809_s0 }
  0x19   :  { %p566_p10 = pnand %p564_p9, %p561_p8 }
  0x1b   :  { %569 = shalt.err (!%p566_p10)
}
  0x1c   :  { %s570_s1 = scalar_lea.vmem %s23_s16, 32  ;;  %p575_p12 = scmp.lt.s32.totalorder %s23_s16, %s23_s16 }
  0x1d   :  { %p571_p11 = scmp.ne.s32.totalorder %s23_s16, %s570_s1  ;;  %p576_p13 = scmp.lt.s32.totalorder %s570_s1, %s570_s1 }
  0x1f   :  { %p577_p0 = por %p576_p13, %p575_p12 }
  0x21   :  { %p578_p1 = pnand %p577_p0, %p571_p11 }
  0x23   :  { %581 = shalt.err (!%p578_p1)
}
  0x24   :  { %25 = dma.hbm_to_vmem [thread:$0]  %s809_s0, 32, %s23_s16, [#allocation3]  }
  0x25   :  { %s582_s30 = scalar_lea.hbm %s812_s3, 1024 }
  0x26   :  { %p583_p2 = scmp.ne.s32.totalorder %s812_s3, %s582_s30  ;;  %p586_p3 = scmp.lt.u32.totalorder %s582_s30, %s812_s3 }
  0x28   :  { %p588_p4 = pnand %p586_p3, %p583_p2 }
  0x2a   :  { %591 = shalt.err (!%p588_p4)
}
  0x2b   :  { %s592_s14 = scalar_lea.vmem %s46_s18, 1024  ;;  %p597_p6 = scmp.lt.s32.totalorder %s46_s18, %s46_s18 }
  0x2c   :  { %p593_p5 = scmp.ne.s32.totalorder %s46_s18, %s592_s14  ;;  %p598_p7 = scmp.lt.s32.totalorder %s592_s14, %s592_s14 }
  0x2e   :  { %p599_p8 = por %p598_p7, %p597_p6 }
  0x30   :  { %p600_p9 = pnand %p599_p8, %p593_p5 }
  0x32   :  { %603 = shalt.err (!%p600_p9)
}
  0x33   :  { %51 = dma.hbm_to_vmem [thread:$0]  %s812_s3, 1024, %s46_s18, [#allocation6], %s657_s11, %s657_s11, %s658_s12  }
  0x34   :  { %s661_s16 = smov [#allocation8]   ;;  %s604_s21 = scalar_lea.hbm %s814_s5, 1024 }
  0x35   :  { %s59_s17 = sshll.u32 %s661_s16, 4  ;;  %p605_p10 = scmp.ne.s32.totalorder %s814_s5, %s604_s21  ;;  %s60_s17 = int_to_ptr.vmem [resolvable:$true] %s59_s17 }
  0x36   :  { %p608_p11 = scmp.lt.u32.totalorder %s604_s21, %s814_s5 }
  0x38   :  { %p610_p12 = pnand %p608_p11, %p605_p10 }
  0x3a   :  { %613 = shalt.err (!%p610_p12)
}
  0x3b   :  { %s614_s1 = scalar_lea.vmem %s60_s17, 1024  ;;  %p619_p0 = scmp.lt.s32.totalorder %s60_s17, %s60_s17 }
  0x3c   :  { %p615_p13 = scmp.ne.s32.totalorder %s60_s17, %s614_s1  ;;  %p620_p1 = scmp.lt.s32.totalorder %s614_s1, %s614_s1 }
  0x3e   :  { %p621_p2 = por %p620_p1, %p619_p0 }
  0x40   :  { %p622_p3 = pnand %p621_p2, %p615_p13 }
  0x42   :  { %625 = shalt.err (!%p622_p3)
}
  0x43   :  { %65 = dma.hbm_to_vmem [thread:$0]  %s814_s5, 1024, %s60_s17, [#allocation9], %s657_s11, %s657_s11, %s658_s12  }
  0x44   :  { %648 = dma.done.wait [#allocation3], 32  }
  0x45   :  { %649 = vsyncadd [#allocation3], 4294967264 }
  0x46   :  { %650 = dma.done.wait [#allocation6], 1536  }
  0x47   :  { %651 = vsyncadd [#allocation6], 4294965760 }
  0x48   :  { %652 = dma.done.wait [#allocation9], 1024  }
  0x49   :  { %653 = vsyncadd [#allocation9], 4294966272  ;;  %v662_v0 = vmov 0.0   ;;  %vm663_vm0 = vmmov 0   ;;  %v518_v1 = vld [vmem:[#allocation5] sm:$0xff]   ;;  %v519_v2 = vld [vmem:[#allocation5 + $0x8] sm:$0xff]  }
  0x4a   :  { %457 = vmatprep.subr.bf16.mxu0 %v662_v0  ;;  %465 = vmatprep.mubr.msk.bf16.mxu0 %vm663_vm0, %v662_v0  ;;  %v522_v3 = vld [vmem:[#allocation7] sm:$0xff]   ;;  %v520_v4 = vld [vmem:[#allocation5 + $0x10] sm:$0xff]   ;;  %v523_v5 = vld [vmem:[#allocation7 + $0x8] sm:$0xff]   ;;  %vm122_vm1 = vcmask 523264   ;;  %s664_s28 = smov [#allocation10]  }
  0x4b   :  { %469 = vmatprep.subr.bf16.mxu1 %v662_v0  ;;  %485 = vmatprep.mubr.msk.bf16.mxu1 %vm663_vm0, %v662_v0  ;;  %v521_v6 = vld [vmem:[#allocation5 + $0x18] sm:$0xff]   ;;  %v524_v8 = vld [vmem:[#allocation7 + $0x10] sm:$0xff]   ;;  %v526_v11 = vld [vmem:[#allocation7 + $0x20] sm:$0xff]   ;;  %s399_s29 = sshll.u32 %s664_s28, 4  ;;  %s400_s29 = int_to_ptr.vmem [resolvable:$true] %s399_s29 }
  0x4c   :  { %458 = vmatpush3.bf16.msra.mxu0 %v518_v1  ;;  %470 = vmatpush3.bf16.msra.mxu1 %v522_v3  ;;  %v81_v7 = vld [vmem:[#allocation2] sm:$0x3]  ;;  %v527_v12 = vld [vmem:[#allocation7 + $0x28] sm:$0xff]   ;;  %v528_v13 = vld [vmem:[#allocation7 + $0x30] sm:$0xff]   ;;  %p631_p5 = scmp.lt.s32.totalorder %s400_s29, %s400_s29 }
  0x4d   :  { %459 = vmatprep.subr.bf16.mxu0 %v662_v0  ;;  %471 = vmatprep.subr.bf16.mxu1 %v662_v0  ;;  %v82_v9 = vpack.c.bf16 %v81_v7, %v81_v7  ;;  %v525_v10 = vld [vmem:[#allocation7 + $0x18] sm:$0xff]   ;;  %v530_v15 = vld [vmem:[#allocation8] sm:$0xff]   ;;  %v531_v16 = vld [vmem:[#allocation8 + $0x8] sm:$0xff]  }
  0x4e   :  { %v529_v14 = vld [vmem:[#allocation7 + $0x38] sm:$0xff]   ;;  %v532_v17 = vld [vmem:[#allocation8 + $0x10] sm:$0xff]   ;;  %v534_v19 = vld [vmem:[#allocation8 + $0x20] sm:$0xff]  }
  0x4f   :  { %v533_v18 = vld [vmem:[#allocation8 + $0x18] sm:$0xff]   ;;  %v535_v20 = vld [vmem:[#allocation8 + $0x28] sm:$0xff]   ;;  %v536_v29 = vld [vmem:[#allocation8 + $0x30] sm:$0xff]  }
  0x50   :  { %460 = vmatpush3.bf16.msra.mxu0 %v519_v2  ;;  %472 = vmatpush3.bf16.msra.mxu1 %v523_v5  ;;  %v410_v21 = vld [vmem:[%s811_s2] ss:$0 sm:$0xff] }
  0x51   :  { %461 = vmatprep.subr.bf16.mxu0 %v662_v0  ;;  %473 = vmatprep.subr.bf16.mxu1 %v662_v0  ;;  %v537_v30 = vld [vmem:[#allocation8 + $0x38] sm:$0xff]  }
  0x52   :  { %v416_v31 = vld [vmem:[%s813_s4] ss:$0 sm:$0xff]  ;;  %s626_s4 = scalar_lea.vmem %s400_s29, 32 }
  0x53   :  { %v425_v39 = vld [vmem:[%s815_s6] ss:$0 sm:$0xff]  ;;  %p627_p4 = scmp.ne.s32.totalorder %s400_s29, %s626_s4  ;;  %p632_p6 = scmp.lt.s32.totalorder %s626_s4, %s626_s4 }
  0x54   :  { %462 = vmatpush3.bf16.msra.mxu0 %v520_v4  ;;  %474 = vmatpush3.bf16.msra.mxu1 %v524_v8 }
  0x55   :  { %463 = vmatprep.subr.bf16.mxu0 %v662_v0  ;;  %475 = vmatprep.subr.bf16.mxu1 %v662_v0  ;;  %p633_p7 = por %p632_p6, %p631_p5 }
  0x57   :  { %p634_p8 = pnand %p633_p7, %p627_p4 }
  0x58   :  { %464 = vmatpush3.bf16.msra.mxu0 %v521_v6  ;;  %476 = vmatpush3.bf16.msra.mxu1 %v525_v10 }
  0x59   :  { %489 = vmatprep.subr.bf16.mxu0 %v662_v0  ;;  %477 = vmatprep.subr.bf16.mxu1 %v662_v0 }
  0x5b   :  { %466 = vmatmul.mubr.msk.bf16.vlgmr.msra.gmra.mrb[0].mxu0 %vm122_vm1, %v82_v9 }
  0x5c   :  { %505 = vmatprep.mubr.msk.bf16.mxu0 %vm663_vm0, %v662_v0  ;;  %478 = vmatpush3.bf16.msra.mxu1 %v526_v11 }
  0x5d   :  { %479 = vmatprep.subr.bf16.mxu1 %v662_v0  ;;  %490 = vmatpush3.bf16.msra.mxu0 %v530_v15 }
  0x5e   :  { %491 = vmatprep.subr.bf16.mxu0 %v662_v0 }
  0x60   :  { %480 = vmatpush3.bf16.msra.mxu1 %v527_v12 }
  0x61   :  { %481 = vmatprep.subr.bf16.mxu1 %v662_v0  ;;  %492 = vmatpush3.bf16.msra.mxu0 %v531_v16 }
  0x62   :  { %493 = vmatprep.subr.bf16.mxu0 %v662_v0 }
  0x64   :  { %482 = vmatpush3.bf16.msra.mxu1 %v528_v13 }
  0x65   :  { %483 = vmatprep.subr.bf16.mxu1 %v662_v0  ;;  %494 = vmatpush3.bf16.msra.mxu0 %v532_v17 }
  0x66   :  { %495 = vmatprep.subr.bf16.mxu0 %v662_v0 }
  0x68   :  { %484 = vmatpush3.bf16.msra.mxu1 %v529_v14 }
  0x69   :  { %496 = vmatpush3.bf16.msra.mxu0 %v533_v18 }
  0x6a   :  { %497 = vmatprep.subr.bf16.mxu0 %v662_v0 }
  0x6d   :  { %498 = vmatpush3.bf16.msra.mxu0 %v534_v19 }
  0x6e   :  { %499 = vmatprep.subr.bf16.mxu0 %v662_v0 }
  0x71   :  { %500 = vmatpush3.bf16.msra.mxu0 %v535_v20 }
  0x72   :  { %501 = vmatprep.subr.bf16.mxu0 %v662_v0 }
  0x75   :  { %502 = vmatpush3.bf16.msra.mxu0 %v536_v29 }
  0x76   :  { %503 = vmatprep.subr.bf16.mxu0 %v662_v0 }
  0x79   :  { %504 = vmatpush3.bf16.msra.mxu0 %v537_v30 }
 0x12e   :  { %v160_v22 = vpop.f32.mrb[0].mxu0 }
 0x12f   :  { %v161_v23 = vadd.f32 %v410_v21, %v160_v22  ;;  %v467_v24 = vpop.f32.mrb[1].mxu0 }
 0x130   :  { %v163_v25 = vpop.f32.mrb[2].mxu0 }
 0x131   :  { %v166_v26 = vmax.f32 %v161_v23, 0.0  ;;  %v468_v27 = vpop.f32.mrb[3].mxu0 }
 0x133   :  { %v167_v28 = vpack.c.bf16 %v166_v26, %v166_v26 }
 0x135   :  { %486 = vmatmul.mubr.bf16.vlgmr.msra.gmra.mrb[0].mxu1 %v167_v28 }
 0x208   :  { %v273_v32 = vpop.f32.mrb[0].mxu1 }
 0x209   :  { %v274_v33 = vadd.f32 %v416_v31, %v273_v32  ;;  %v487_v34 = vpop.f32.mrb[1].mxu1 }
 0x20a   :  { %v276_v35 = vpop.f32.mrb[2].mxu1 }
 0x20b   :  { %v279_v36 = vmax.f32 %v274_v33, 0.0  ;;  %v488_v37 = vpop.f32.mrb[3].mxu1 }
 0x20d   :  { %v280_v38 = vpack.c.bf16 %v279_v36, %v279_v36 }
 0x20f   :  { %506 = vmatmul.mubr.bf16.vlgmr.msra.gmra.mrb[4].mxu0 %v280_v38 }
 0x2e2   :  { %v386_v40 = vpop.f32.mrb[4].mxu0 }
 0x2e3   :  { %v387_v41 = vadd.f32 %v425_v39, %v386_v40  ;;  %v507_v42 = vpop.f32.mrb[5].mxu0 }
 0x2e4   :  { %v389_v43 = vpop.f32.mrb[6].mxu0 }
 0x2e5   :  { %392 = vst [vmem:[#allocation10] sm:$0x3] %v387_v41  ;;  %v508_v44 = vpop.f32.mrb[7].mxu0 }
 0x2e6   :  { %637 = shalt.err (!%p634_p8)
}
 0x2e7   :  { %s638_s6 = scalar_lea.hbm %s816_s7, 32 }
 0x2e8   :  { %p639_p9 = scmp.ne.s32.totalorder %s816_s7, %s638_s6  ;;  %p642_p10 = scmp.lt.u32.totalorder %s638_s6, %s816_s7 }
 0x2ea   :  { %p644_p11 = pnand %p642_p10, %p639_p9 }
 0x2ec   :  { %647 = shalt.err (!%p644_p11)
}
 0x2ed   :  { %402 = dma.vmem_to_hbm [thread:$0]  %s400_s29, 32, %s816_s7, [#allocation4]  }
 0x2ee   :  { %654 = dma.done.wait [#allocation4], 32  }
 0x2ef   :  { %655 = vsyncadd [#allocation4], 4294967264 }
 0x2f0   :  { %406 = vsyncpa [#allocation3], 1 }
 0x2f1   :  { %407 = vsyncpa [#allocation6], 1 }
 0x2f2   :  { %408 = vsyncpa [#allocation9], 1 }
 0x2f3   :  { %409 = vsyncpa [#allocation4], 1 }

// kernel: tpu_custom_call.1
= control target key start
LH: loop header
LB: loop body
LE: loop exit
PB: predicated region body
PF: predicated region fallthrough
CT: control target
= control target key end

     0   :  { %12 = vsyncpa [#allocation3], 0  ;;  %s809_s0 = inlined_call_operand.hbm [shape: f32[2,64], index: 0, kind: input, shape index: {}]   ;;  %s810_s1 = inlined_call_operand.hbm [shape: bf16[64,128], index: 1, kind: input, shape index: {}]   ;;  %s811_s2 = inlined_call_operand.vmem [shape: f32[1,128], index: 2, kind: input, shape index: {}]   ;;  %s812_s3 = inlined_call_operand.hbm [shape: bf16[128,128], index: 3, kind: input, shape index: {}]   ;;  %s813_s4 = inlined_call_operand.vmem [shape: f32[1,128], index: 4, kind: input, shape index: {}]   ;;  %s814_s5 = inlined_call_operand.hbm [shape: bf16[128,128], index: 5, kind: input, shape index: {}]   ;;  %s815_s6 = inlined_call_operand.vmem [shape: f32[1,128], index: 6, kind: input, shape index: {}]   ;;  %s816_s7 = inlined_call_operand.hbm [shape: f32[2,128], index: 7, kind: output, shape index: {}]  }
   0x1   :  { %13 = vsyncpa [#allocation6], 0 }
   0x2   :  { %14 = vsyncpa [#allocation9], 0 }
   0x3   :  { %15 = vsyncpa [#allocation4], 0  ;;  %s656_s24 = smov [#allocation5]   ;;  %s538_s28 = scalar_lea.hbm %s810_s1, 512 }
   0x4   :  { %s31_s25 = sshll.u32 %s656_s24, 4  ;;  %p539_p0 = scmp.ne.s32.totalorder %s810_s1, %s538_s28  ;;  %s32_s25 = int_to_ptr.vmem [resolvable:$true] %s31_s25 }
   0x5   :  { %p542_p1 = scmp.lt.u32.totalorder %s538_s28, %s810_s1 }
   0x7   :  { %p544_p2 = pnand %p542_p1, %p539_p0 }
   0x9   :  { %547 = shalt.err (!%p544_p2)
}
   0xa   :  { %s548_s10 = scalar_lea.vmem %s32_s25, 512  ;;  %p553_p4 = scmp.lt.s32.totalorder %s32_s25, %s32_s25 }
   0xb   :  { %p549_p3 = scmp.ne.s32.totalorder %s32_s25, %s548_s10  ;;  %p554_p5 = scmp.lt.s32.totalorder %s548_s10, %s548_s10 }
   0xd   :  { %p555_p6 = por %p554_p5, %p553_p4 }
   0xf   :  { %p556_p7 = pnand %p555_p6, %p549_p3 }
  0x11   :  { %559 = shalt.err (!%p556_p7)
}
  0x12   :  { %s657_s11 = smov 64   ;;  %s658_s12 = smov 4  }
  0x13   :  { %37 = dma.hbm_to_vmem [thread:$0]  %s810_s1, 512, %s32_s25, [#allocation6], %s657_s11, %s657_s11, %s658_s12  }
  0x14   :  { %s659_s15 = smov [#allocation2]   ;;  %s660_s17 = smov [#allocation7]  }
  0x15   :  { %s22_s16 = sshll.u32 %s659_s15, 4  ;;  %s45_s18 = sshll.u32 %s660_s17, 4  ;;  %s23_s16 = int_to_ptr.vmem [resolvable:$true] %s22_s16  ;;  %s46_s18 = int_to_ptr.vmem [resolvable:$true] %s45_s18 }
  0x16   :  { %s560_s21 = scalar_lea.hbm %s809_s0, 32 }
  0x17   :  { %p561_p8 = scmp.ne.s32.totalorder %s809_s0, %s560_s21  ;;  %p564_p9 = scmp.lt.u32.totalorder %s560_s21, %s809_s0 }
  0x19   :  { %p566_p10 = pnand %p564_p9, %p561_p8 }
  0x1b   :  { %569 = shalt.err (!%p566_p10)
}
  0x1c   :  { %s570_s1 = scalar_lea.vmem %s23_s16, 32  ;;  %p575_p12 = scmp.lt.s32.totalorder %s23_s16, %s23_s16 }
  0x1d   :  { %p571_p11 = scmp.ne.s32.totalorder %s23_s16, %s570_s1  ;;  %p576_p13 = scmp.lt.s32.totalorder %s570_s1, %s570_s1 }
  0x1f   :  { %p577_p0 = por %p576_p13, %p575_p12 }
  0x21   :  { %p578_p1 = pnand %p577_p0, %p571_p11 }
  0x23   :  { %581 = shalt.err (!%p578_p1)
}
  0x24   :  { %25 = dma.hbm_to_vmem [thread:$0]  %s809_s0, 32, %s23_s16, [#allocation3]  }
  0x25   :  { %s582_s30 = scalar_lea.hbm %s812_s3, 1024 }
  0x26   :  { %p583_p2 = scmp.ne.s32.totalorder %s812_s3, %s582_s30  ;;  %p586_p3 = scmp.lt.u32.totalorder %s582_s30, %s812_s3 }
  0x28   :  { %p588_p4 = pnand %p586_p3, %p583_p2 }
  0x2a   :  { %591 = shalt.err (!%p588_p4)
}
  0x2b   :  { %s592_s14 = scalar_lea.vmem %s46_s18, 1024  ;;  %p597_p6 = scmp.lt.s32.totalorder %s46_s18, %s46_s18 }
  0x2c   :  { %p593_p5 = scmp.ne.s32.totalorder %s46_s18, %s592_s14  ;;  %p598_p7 = scmp.lt.s32.totalorder %s592_s14, %s592_s14 }
  0x2e   :  { %p599_p8 = por %p598_p7, %p597_p6 }
  0x30   :  { %p600_p9 = pnand %p599_p8, %p593_p5 }
  0x32   :  { %603 = shalt.err (!%p600_p9)
}
  0x33   :  { %51 = dma.hbm_to_vmem [thread:$0]  %s812_s3, 1024, %s46_s18, [#allocation6], %s657_s11, %s657_s11, %s658_s12  }
  0x34   :  { %s661_s16 = smov [#allocation8]   ;;  %s604_s21 = scalar_lea.hbm %s814_s5, 1024 }
  0x35   :  { %s59_s17 = sshll.u32 %s661_s16, 4  ;;  %p605_p10 = scmp.ne.s32.totalorder %s814_s5, %s604_s21  ;;  %s60_s17 = int_to_ptr.vmem [resolvable:$true] %s59_s17 }
  0x36   :  { %p608_p11 = scmp.lt.u32.totalorder %s604_s21, %s814_s5 }
  0x38   :  { %p610_p12 = pnand %p608_p11, %p605_p10 }
  0x3a   :  { %613 = shalt.err (!%p610_p12)
}
  0x3b   :  { %s614_s1 = scalar_lea.vmem %s60_s17, 1024  ;;  %p619_p0 = scmp.lt.s32.totalorder %s60_s17, %s60_s17 }
  0x3c   :  { %p615_p13 = scmp.ne.s32.totalorder %s60_s17, %s614_s1  ;;  %p620_p1 = scmp.lt.s32.totalorder %s614_s1, %s614_s1 }
  0x3e   :  { %p621_p2 = por %p620_p1, %p619_p0 }
  0x40   :  { %p622_p3 = pnand %p621_p2, %p615_p13 }
  0x42   :  { %625 = shalt.err (!%p622_p3)
}
  0x43   :  { %65 = dma.hbm_to_vmem [thread:$0]  %s814_s5, 1024, %s60_s17, [#allocation9], %s657_s11, %s657_s11, %s658_s12  }
  0x44   :  { %648 = dma.done.wait [#allocation3], 32  }
  0x45   :  { %649 = vsyncadd [#allocation3], 4294967264 }
  0x46   :  { %650 = dma.done.wait [#allocation6], 1536  }
  0x47   :  { %651 = vsyncadd [#allocation6], 4294965760 }
  0x48   :  { %652 = dma.done.wait [#allocation9], 1024  }
  0x49   :  { %653 = vsyncadd [#allocation9], 4294966272  ;;  %v662_v0 = vmov 0.0   ;;  %vm663_vm0 = vmmov 0   ;;  %v518_v1 = vld [vmem:[#allocation5] sm:$0xff]   ;;  %v519_v2 = vld [vmem:[#allocation5 + $0x8] sm:$0xff]  }
  0x4a   :  { %457 = vmatprep.subr.bf16.mxu0 %v662_v0  ;;  %465 = vmatprep.mubr.msk.bf16.mxu0 %vm663_vm0, %v662_v0  ;;  %v522_v3 = vld [vmem:[#allocation7] sm:$0xff]   ;;  %v520_v4 = vld [vmem:[#allocation5 + $0x10] sm:$0xff]   ;;  %v523_v5 = vld [vmem:[#allocation7 + $0x8] sm:$0xff]   ;;  %vm122_vm1 = vcmask 523264   ;;  %s664_s28 = smov [#allocation10]  }
  0x4b   :  { %469 = vmatprep.subr.bf16.mxu1 %v662_v0  ;;  %485 = vmatprep.mubr.msk.bf16.mxu1 %vm663_vm0, %v662_v0  ;;  %v521_v6 = vld [vmem:[#allocation5 + $0x18] sm:$0xff]   ;;  %v524_v8 = vld [vmem:[#allocation7 + $0x10] sm:$0xff]   ;;  %v526_v11 = vld [vmem:[#allocation7 + $0x20] sm:$0xff]   ;;  %s399_s29 = sshll.u32 %s664_s28, 4  ;;  %s400_s29 = int_to_ptr.vmem [resolvable:$true] %s399_s29 }
  0x4c   :  { %458 = vmatpush3.bf16.msra.mxu0 %v518_v1  ;;  %470 = vmatpush3.bf16.msra.mxu1 %v522_v3  ;;  %v81_v7 = vld [vmem:[#allocation2] sm:$0x3]  ;;  %v527_v12 = vld [vmem:[#allocation7 + $0x28] sm:$0xff]   ;;  %v528_v13 = vld [vmem:[#allocation7 + $0x30] sm:$0xff]   ;;  %p631_p5 = scmp.lt.s32.totalorder %s400_s29, %s400_s29 }
  0x4d   :  { %459 = vmatprep.subr.bf16.mxu0 %v662_v0  ;;  %471 = vmatprep.subr.bf16.mxu1 %v662_v0  ;;  %v82_v9 = vpack.c.bf16 %v81_v7, %v81_v7  ;;  %v525_v10 = vld [vmem:[#allocation7 + $0x18] sm:$0xff]   ;;  %v530_v15 = vld [vmem:[#allocation8] sm:$0xff]   ;;  %v531_v16 = vld [vmem:[#allocation8 + $0x8] sm:$0xff]  }
  0x4e   :  { %v529_v14 = vld [vmem:[#allocation7 + $0x38] sm:$0xff]   ;;  %v532_v17 = vld [vmem:[#allocation8 + $0x10] sm:$0xff]   ;;  %v534_v19 = vld [vmem:[#allocation8 + $0x20] sm:$0xff]  }
  0x4f   :  { %v533_v18 = vld [vmem:[#allocation8 + $0x18] sm:$0xff]   ;;  %v535_v20 = vld [vmem:[#allocation8 + $0x28] sm:$0xff]   ;;  %v536_v29 = vld [vmem:[#allocation8 + $0x30] sm:$0xff]  }
  0x50   :  { %460 = vmatpush3.bf16.msra.mxu0 %v519_v2  ;;  %472 = vmatpush3.bf16.msra.mxu1 %v523_v5  ;;  %v410_v21 = vld [vmem:[%s811_s2] ss:$0 sm:$0xff] }
  0x51   :  { %461 = vmatprep.subr.bf16.mxu0 %v662_v0  ;;  %473 = vmatprep.subr.bf16.mxu1 %v662_v0  ;;  %v537_v30 = vld [vmem:[#allocation8 + $0x38] sm:$0xff]  }
  0x52   :  { %v416_v31 = vld [vmem:[%s813_s4] ss:$0 sm:$0xff]  ;;  %s626_s4 = scalar_lea.vmem %s400_s29, 32 }
  0x53   :  { %v425_v39 = vld [vmem:[%s815_s6] ss:$0 sm:$0xff]  ;;  %p627_p4 = scmp.ne.s32.totalorder %s400_s29, %s626_s4  ;;  %p632_p6 = scmp.lt.s32.totalorder %s626_s4, %s626_s4 }
  0x54   :  { %462 = vmatpush3.bf16.msra.mxu0 %v520_v4  ;;  %474 = vmatpush3.bf16.msra.mxu1 %v524_v8 }
  0x55   :  { %463 = vmatprep.subr.bf16.mxu0 %v662_v0  ;;  %475 = vmatprep.subr.bf16.mxu1 %v662_v0  ;;  %p633_p7 = por %p632_p6, %p631_p5 }
  0x57   :  { %p634_p8 = pnand %p633_p7, %p627_p4 }
  0x58   :  { %464 = vmatpush3.bf16.msra.mxu0 %v521_v6  ;;  %476 = vmatpush3.bf16.msra.mxu1 %v525_v10 }
  0x59   :  { %489 = vmatprep.subr.bf16.mxu0 %v662_v0  ;;  %477 = vmatprep.subr.bf16.mxu1 %v662_v0 }
  0x5b   :  { %466 = vmatmul.mubr.msk.bf16.vlgmr.msra.gmra.mrb[0].mxu0 %vm122_vm1, %v82_v9 }
  0x5c   :  { %505 = vmatprep.mubr.msk.bf16.mxu0 %vm663_vm0, %v662_v0  ;;  %478 = vmatpush3.bf16.msra.mxu1 %v526_v11 }
  0x5d   :  { %479 = vmatprep.subr.bf16.mxu1 %v662_v0  ;;  %490 = vmatpush3.bf16.msra.mxu0 %v530_v15 }
  0x5e   :  { %491 = vmatprep.subr.bf16.mxu0 %v662_v0 }
  0x60   :  { %480 = vmatpush3.bf16.msra.mxu1 %v527_v12 }
  0x61   :  { %481 = vmatprep.subr.bf16.mxu1 %v662_v0  ;;  %492 = vmatpush3.bf16.msra.mxu0 %v531_v16 }
  0x62   :  { %493 = vmatprep.subr.bf16.mxu0 %v662_v0 }
  0x64   :  { %482 = vmatpush3.bf16.msra.mxu1 %v528_v13 }
  0x65   :  { %483 = vmatprep.subr.bf16.mxu1 %v662_v0  ;;  %494 = vmatpush3.bf16.msra.mxu0 %v532_v17 }
  0x66   :  { %495 = vmatprep.subr.bf16.mxu0 %v662_v0 }
  0x68   :  { %484 = vmatpush3.bf16.msra.mxu1 %v529_v14 }
  0x69   :  { %496 = vmatpush3.bf16.msra.mxu0 %v533_v18 }
  0x6a   :  { %497 = vmatprep.subr.bf16.mxu0 %v662_v0 }
  0x6d   :  { %498 = vmatpush3.bf16.msra.mxu0 %v534_v19 }
  0x6e   :  { %499 = vmatprep.subr.bf16.mxu0 %v662_v0 }
  0x71   :  { %500 = vmatpush3.bf16.msra.mxu0 %v535_v20 }
  0x72   :  { %501 = vmatprep.subr.bf16.mxu0 %v662_v0 }
  0x75   :  { %502 = vmatpush3.bf16.msra.mxu0 %v536_v29 }
  0x76   :  { %503 = vmatprep.subr.bf16.mxu0 %v662_v0 }
  0x79   :  { %504 = vmatpush3.bf16.msra.mxu0 %v537_v30 }
 0x12e   :  { %v160_v22 = vpop.f32.mrb[0].mxu0 }
 0x12f   :  { %v161_v23 = vadd.f32 %v410_v21, %v160_v22  ;;  %v467_v24 = vpop.f32.mrb[1].mxu0 }
 0x130   :  { %v163_v25 = vpop.f32.mrb[2].mxu0 }
 0x131   :  { %v166_v26 = vmax.f32 %v161_v23, 0.0  ;;  %v468_v27 = vpop.f32.mrb[3].mxu0 }
 0x133   :  { %v167_v28 = vpack.c.bf16 %v166_v26, %v166_v26 }
 0x135   :  { %486 = vmatmul.mubr.bf16.vlgmr.msra.gmra.mrb[0].mxu1 %v167_v28 }
 0x208   :  { %v273_v32 = vpop.f32.mrb[0].mxu1 }
 0x209   :  { %v274_v33 = vadd.f32 %v416_v31, %v273_v32  ;;  %v487_v34 = vpop.f32.mrb[1].mxu1 }
 0x20a   :  { %v276_v35 = vpop.f32.mrb[2].mxu1 }
 0x20b   :  { %v279_v36 = vmax.f32 %v274_v33, 0.0  ;;  %v488_v37 = vpop.f32.mrb[3].mxu1 }
 0x20d   :  { %v280_v38 = vpack.c.bf16 %v279_v36, %v279_v36 }
 0x20f   :  { %506 = vmatmul.mubr.bf16.vlgmr.msra.gmra.mrb[4].mxu0 %v280_v38 }
 0x2e2   :  { %v386_v40 = vpop.f32.mrb[4].mxu0 }
 0x2e3   :  { %v387_v41 = vadd.f32 %v425_v39, %v386_v40  ;;  %v507_v42 = vpop.f32.mrb[5].mxu0 }
 0x2e4   :  { %v389_v43 = vpop.f32.mrb[6].mxu0 }
 0x2e5   :  { %392 = vst [vmem:[#allocation10] sm:$0x3] %v387_v41  ;;  %v508_v44 = vpop.f32.mrb[7].mxu0 }
 0x2e6   :  { %637 = shalt.err (!%p634_p8)
}
 0x2e7   :  { %s638_s6 = scalar_lea.hbm %s816_s7, 32 }
 0x2e8   :  { %p639_p9 = scmp.ne.s32.totalorder %s816_s7, %s638_s6  ;;  %p642_p10 = scmp.lt.u32.totalorder %s638_s6, %s816_s7 }
 0x2ea   :  { %p644_p11 = pnand %p642_p10, %p639_p9 }
 0x2ec   :  { %647 = shalt.err (!%p644_p11)
}
 0x2ed   :  { %402 = dma.vmem_to_hbm [thread:$0]  %s400_s29, 32, %s816_s7, [#allocation4]  }
 0x2ee   :  { %654 = dma.done.wait [#allocation4], 32  }
 0x2ef   :  { %655 = vsyncadd [#allocation4], 4294967264 }
 0x2f0   :  { %406 = vsyncpa [#allocation3], 1 }
 0x2f1   :  { %407 = vsyncpa [#allocation6], 1 }
 0x2f2   :  { %408 = vsyncpa [#allocation9], 1 }
 0x2f3   :  { %409 = vsyncpa [#allocation4], 1 }

// kernel: tpu_custom_call.1
= control target key start
LH: loop header
LB: loop body
LE: loop exit
PB: predicated region body
PF: predicated region fallthrough
CT: control target
= control target key end

     0   :  { %8 = vsyncpa [#allocation4], 0  ;;  %s338_s0 = inlined_call_operand.hbm [shape: f32[2,64], index: 0, kind: input, shape index: {}]   ;;  %s339_s1 = inlined_call_operand.hbm [shape: bf16[64,128], index: 1, kind: input, shape index: {}]   ;;  %s340_s2 = inlined_call_operand.vmem [shape: f32[1,128], index: 2, kind: input, shape index: {}]   ;;  %s341_s3 = inlined_call_operand.hbm [shape: bf16[2,128], index: 3, kind: output, shape index: {}]  }
   0x1   :  { %9 = vsyncpa [#allocation7], 0 }
   0x2   :  { %10 = vsyncpa [#allocation5], 0  ;;  %s265_s12 = smov [#allocation3]   ;;  %s266_s14 = smov [#allocation6]  }
   0x3   :  { %s17_s13 = sshll.u32 %s265_s12, 4  ;;  %s26_s15 = sshll.u32 %s266_s14, 4  ;;  %s18_s13 = int_to_ptr.vmem [resolvable:$true] %s17_s13  ;;  %s292_s15 = int_to_ptr.vmem [resolvable:$true] %s26_s15 }
   0x4   :  { %s193_s18 = scalar_lea.hbm %s338_s0, 32 }
   0x5   :  { %p194_p0 = scmp.ne.s32.totalorder %s338_s0, %s193_s18  ;;  %p197_p1 = scmp.lt.u32.totalorder %s193_s18, %s338_s0 }
   0x7   :  { %p199_p2 = pnand %p197_p1, %p194_p0 }
   0x9   :  { %202 = shalt.err (!%p199_p2)
}
   0xa   :  { %s203_s23 = scalar_lea.vmem %s18_s13, 32  ;;  %p208_p4 = scmp.lt.s32.totalorder %s18_s13, %s18_s13 }
   0xb   :  { %p204_p3 = scmp.ne.s32.totalorder %s18_s13, %s203_s23  ;;  %p209_p5 = scmp.lt.s32.totalorder %s203_s23, %s203_s23 }
   0xd   :  { %p210_p6 = por %p209_p5, %p208_p4 }
   0xf   :  { %p211_p7 = pnand %p210_p6, %p204_p3 }
  0x11   :  { %214 = shalt.err (!%p211_p7)
}
  0x12   :  { %20 = dma.hbm_to_vmem [thread:$0]  %s338_s0, 32, %s18_s13, [#allocation4]  }
  0x13   :  { %s215_s28 = scalar_lea.hbm %s339_s1, 512 }
  0x14   :  { %p216_p8 = scmp.ne.s32.totalorder %s339_s1, %s215_s28  ;;  %p219_p9 = scmp.lt.u32.totalorder %s215_s28, %s339_s1 }
  0x16   :  { %p221_p10 = pnand %p219_p9, %p216_p8 }
  0x18   :  { %224 = shalt.err (!%p221_p10)
}
  0x19   :  { %s225_s6 = scalar_lea.vmem %s292_s15, 512  ;;  %p230_p12 = scmp.lt.s32.totalorder %s292_s15, %s292_s15 }
  0x1a   :  { %p226_p11 = scmp.ne.s32.totalorder %s292_s15, %s225_s6  ;;  %p231_p13 = scmp.lt.s32.totalorder %s225_s6, %s225_s6 }
  0x1c   :  { %p232_p0 = por %p231_p13, %p230_p12 }
  0x1e   :  { %p233_p1 = pnand %p232_p0, %p226_p11 }
  0x20   :  { %236 = shalt.err (!%p233_p1)
}
  0x21   :  { %s267_s0 = smov 64   ;;  %s268_s7 = smov 4  }
  0x22   :  { %32 = dma.hbm_to_vmem [thread:$0]  %s339_s1, 512, %s292_s15, [#allocation7], %s267_s0, %s267_s0, %s268_s7  }
  0x23   :  { %259 = dma.done.wait [#allocation4], 32  }
  0x24   :  { %260 = vsyncadd [#allocation4], 4294967264 }
  0x25   :  { %261 = dma.done.wait [#allocation7], 512  }
  0x26   :  { %262 = vsyncadd [#allocation7], 4294966784  ;;  %v269_v0 = vmov 0.0   ;;  %vm270_vm0 = vmmov 0   ;;  %v189_v1 = vld [vmem:[#allocation6] sm:$0xff]   ;;  %v190_v2 = vld [vmem:[#allocation6 + $0x8] sm:$0xff]  }
  0x27   :  { %170 = vmatprep.subr.bf16.mxu0 %v269_v0  ;;  %46 = vst [vmem:[#allocation2] sm:$0x3] %v269_v0  ;;  %178 = vmatprep.mubr.msk.bf16.mxu0 %vm270_vm0, %v269_v0  ;;  %v191_v3 = vld [vmem:[#allocation6 + $0x10] sm:$0xff]   ;;  %v192_v4 = vld [vmem:[#allocation6 + $0x18] sm:$0xff]   ;;  %vm82_vm1 = vcmask 523264   ;;  %s271_s11 = smov [#allocation8]  }
  0x28   :  { %171 = vmatpush3.bf16.msra.mxu0 %v189_v1  ;;  %v48_v5 = vld [vmem:[#allocation3] sm:$0x3]  ;;  %v164_v13 = vld [vmem:[%s340_s2] ss:$0 sm:$0xff]  ;;  %s149_s12 = sshll.u32 %s271_s11, 4  ;;  %s150_s12 = int_to_ptr.vmem [resolvable:$true] %s149_s12 }
  0x29   :  { %172 = vmatprep.subr.bf16.mxu0 %v269_v0  ;;  %v49_v6 = vpack.c.bf16 %v48_v5, %v48_v5  ;;  %s237_s13 = scalar_lea.vmem %s150_s12, 16  ;;  %s241_s14 = scalar_lea.vmem %s150_s12, 32 }
  0x2a   :  { %p238_p2 = scmp.ne.s32.totalorder %s150_s12, %s237_s13  ;;  %p242_p3 = scmp.lt.s32.totalorder %s150_s12, %s150_s12 }
  0x2b   :  { %p243_p4 = scmp.lt.s32.totalorder %s241_s14, %s237_s13 }
  0x2c   :  { %173 = vmatpush3.bf16.msra.mxu0 %v190_v2 }
  0x2d   :  { %174 = vmatprep.subr.bf16.mxu0 %v269_v0  ;;  %p244_p5 = por %p243_p4, %p242_p3 }
  0x2e   :  { %v47_v7 = vld [vmem:[#allocation2] sm:$0x3] }
  0x2f   :  { %p245_p6 = pnand %p244_p5, %p238_p2 }
  0x30   :  { %175 = vmatpush3.bf16.msra.mxu0 %v191_v3 }
  0x31   :  { %176 = vmatprep.subr.bf16.mxu0 %v269_v0 }
  0x34   :  { %177 = vmatpush3.bf16.msra.mxu0 %v192_v4 }
  0x37   :  { %179 = vmatmul.mubr.msk.bf16.vlgmr.msra.gmra.mrb[0].mxu0 %vm82_vm1, %v49_v6 }
 0x10a   :  { %v120_v8 = vpop.f32.mrb[0].mxu0 }
 0x10b   :  { %v126_v9 = vadd.f32 %v120_v8, %v47_v7  ;;  %v180_v10 = vpop.f32.mrb[1].mxu0 }
 0x10c   :  { %v123_v11 = vpop.f32.mrb[2].mxu0 }
 0x10d   :  { %127 = vst [vmem:[#allocation2] sm:$0x3] %v126_v9  ;;  %v181_v12 = vpop.f32.mrb[3].mxu0 }
 0x114   :  { %v131_v14 = vld [vmem:[#allocation2] sm:$0x3] }
 0x115   :  { %v139_v15 = vadd.f32 %v164_v13, %v131_v14 }
 0x117   :  { %v140_v16 = vmax.f32 %v139_v15, 0.0 }
 0x119   :  { %v141_v17 = vpack.c.bf16 %v140_v16, %v140_v16 }
 0x11b   :  { %142 = vst [vmem:[#allocation8] sm:$0x1] %v141_v17 }
 0x11c   :  { %248 = shalt.err (!%p245_p6)
}
 0x11d   :  { %s249_s2 = scalar_lea.hbm %s341_s3, 16 }
 0x11e   :  { %p250_p7 = scmp.ne.s32.totalorder %s341_s3, %s249_s2  ;;  %p253_p8 = scmp.lt.u32.totalorder %s249_s2, %s341_s3 }
 0x120   :  { %p255_p9 = pnand %p253_p8, %p250_p7 }
 0x122   :  { %258 = shalt.err (!%p255_p9)
}
 0x123   :  { %152 = dma.vmem_to_hbm [thread:$0]  %s150_s12, 16, %s341_s3, [#allocation5]  }
 0x124   :  { %263 = dma.done.wait [#allocation5], 16  }
 0x125   :  { %264 = vsyncadd [#allocation5], 4294967280 }
 0x126   :  { %156 = vsyncpa [#allocation4], 1 }
 0x127   :  { %157 = vsyncpa [#allocation7], 1 }
 0x128   :  { %158 = vsyncpa [#allocation5], 1 }

</bundles_post_ra>
